<compile_context>
chip_gen: v6e
topology: v6e:2x2x1
jax: 0.10.0
libtpu: 0.0.40
codegen_flags: <defaults>
</compile_context>

<pallas_src>
import jax
import jax.numpy as jnp
from jax.experimental import pallas as pl
from jax.experimental.pallas import tpu as pltpu


# ---------------------------------------------------------------------------
# Pass 1 (per row tile): mean aggregation + fused projection + leaky_relu,
# plus per-tile BatchNorm partial statistics.
# ---------------------------------------------------------------------------
def _sage_pre_kernel(a_ref, h_tile_ref, h_all_ref, wcat_ref, bcat_ref,
                     rst_ref, stats_ref):
    a = a_ref[...]                                        # (tm, N)
    deg = jnp.sum(a, axis=-1, keepdims=True)              # (tm, 1)
    inv_deg = pl.reciprocal(jnp.maximum(deg, 1.0), approx=True)   # EUP, ~free
    h_neigh = jnp.dot(a, h_all_ref[...],
                      preferred_element_type=jnp.float32) * inv_deg

    # One MXU push with K = 2*F instead of two K=F pushes.
    x_cat = jnp.concatenate([h_tile_ref[...], h_neigh], axis=-1)   # (tm, 2F)
    rst = jnp.dot(x_cat, wcat_ref[...],
                  preferred_element_type=jnp.float32) + bcat_ref[...]

    # leaky_relu(negative_slope=0.01)
    rst = jnp.where(rst > 0, rst, 0.01 * rst)
    rst_ref[...] = rst

    # Per-tile partial BN statistics; reduced across tiles outside the kernel
    # so batch statistics stay global (per-tile mean/var would be wrong).
    s = jnp.sum(rst, axis=0, keepdims=True)               # (1, F)
    ss = jnp.sum(rst * rst, axis=0, keepdims=True)        # (1, F)
    stats_ref[...] = jnp.concatenate([s, ss], axis=0)[None]   # (1, 2, F)


# ---------------------------------------------------------------------------
# Pass 2 (per row tile): BN affine (folded into scale/shift) + residual.
# ---------------------------------------------------------------------------
def _sage_bn_res_kernel(rst_ref, hin_ref, scale_ref, shift_ref, o_ref):
    # out = h_in + (rst - mean) * inv_std * gamma + beta = h_in + rst*scale + shift
    o_ref[...] = hin_ref[...] + rst_ref[...] * scale_ref[...] + shift_ref[...]


def _round_up(x, m):
    return (x + m - 1) // m * m


def _pick_tile(n, target):
    for cand in (target, 512, 256, 128, 64, 32, 16, 8):
        if cand <= n and n % cand == 0:
            return cand
    return n


def graphsage_layer(a, h, w_self, b_self, w_neigh, b_neigh, gamma, beta,
                    *, tile_rows=256, eps=1e-5):
    N, F_in = h.shape
    F_out = w_self.shape[1]
    assert F_in == F_out, "residual path requires in_feats == out_feats"

    # ---- lane-dense padding of the feature axis (multiple of 128) ----------
    fp = _round_up(F_out, 128)

    def pad_feat(x, axes):
        pads = [(0, 0)] * x.ndim
        for ax in axes:
            pads[ax] = (0, fp - x.shape[ax])
        return jnp.pad(x, pads)

    h_p = pad_feat(h.astype(jnp.float32), (1,))                        # (N, fp)
    w_cat = jnp.concatenate(
        [pad_feat(w_self.astype(jnp.float32), (0, 1)),
         pad_feat(w_neigh.astype(jnp.float32), (0, 1))], axis=0)       # (2fp, fp)
    b_cat = pad_feat((b_self + b_neigh).reshape(1, -1).astype(jnp.float32), (1,))
    gamma_p = jnp.pad(gamma.reshape(1, -1).astype(jnp.float32),
                      ((0, 0), (0, fp - F_out)), constant_values=1.0)
    beta_p = pad_feat(beta.reshape(1, -1).astype(jnp.float32), (1,))
    a = a.astype(jnp.float32)

    tm = _pick_tile(N, tile_rows)
    grid = (N // tm,)
    cparams = pltpu.CompilerParams(
        dimension_semantics=("parallel",),          # row tiles are independent
        vmem_limit_bytes=48 * 1024 * 1024,          # safe on v7x's 64 MiB VMEM
    )

    # ---- pass 1: aggregation + projection + activation + BN partials -------
    rst_pre, stats = pl.pallas_call(
        _sage_pre_kernel,
        grid=grid,
        in_specs=[
            pl.BlockSpec((tm, N), lambda i: (i, 0)),        # A row tile
            pl.BlockSpec((tm, fp), lambda i: (i, 0)),       # h rows (self term)
            pl.BlockSpec((N, fp), lambda i: (0, 0)),        # full h (neighbors)
            pl.BlockSpec((2 * fp, fp), lambda i: (0, 0)),   # [W_self; W_neigh]
            pl.BlockSpec((1, fp), lambda i: (0, 0)),        # b_self + b_neigh
        ],
        out_specs=(
            pl.BlockSpec((tm, fp), lambda i: (i, 0)),
            pl.BlockSpec((1, 2, fp), lambda i: (i, 0, 0)),
        ),
        out_shape=(
            jax.ShapeDtypeStruct((N, fp), jnp.float32),
            jax.ShapeDtypeStruct((grid[0], 2, fp), jnp.float32),
        ),
        compiler_params=cparams,
    )(a, h_p, h_p, w_cat, b_cat)

    # ---- global BatchNorm statistics (tiny, outside the kernel) ------------
    tot = jnp.sum(stats, axis=0)                 # (2, fp)
    mean = tot[0:1] / N                          # (1, fp)
    var = tot[1:2] / N - mean * mean             # biased var (PyTorch training BN)
    inv_std = jax.lax.rsqrt(var + eps)
    scale = gamma_p * inv_std                    # (1, fp)
    shift = beta_p - mean * scale                # (1, fp)

    # ---- pass 2: BN affine + residual ---------------------------------------
    out = pl.pallas_call(
        _sage_bn_res_kernel,
        grid=grid,
        in_specs=[
            pl.BlockSpec((tm, fp), lambda i: (i, 0)),
            pl.BlockSpec((tm, fp), lambda i: (i, 0)),
            pl.BlockSpec((1, fp), lambda i: (0, 0)),
            pl.BlockSpec((1, fp), lambda i: (0, 0)),
        ],
        out_specs=pl.BlockSpec((tm, fp), lambda i: (i, 0)),
        out_shape=jax.ShapeDtypeStruct((N, fp), jnp.float32),
        compiler_params=cparams,
    )(rst_pre, h_p, scale, shift)

    return out[:, :F_out]


def reference(a, h, w_self, b_self, w_neigh, b_neigh, gamma, beta):
    deg = jnp.maximum(jnp.sum(a, axis=-1, keepdims=True), 1.0)
    h_neigh = (a @ h) / deg
    rst = h @ w_self + b_self + h_neigh @ w_neigh + b_neigh
    rst = jnp.where(rst > 0, rst, 0.01 * rst)
    mean = jnp.mean(rst, axis=0, keepdims=True)
    var = jnp.mean((rst - mean) ** 2, axis=0, keepdims=True)
    rst = (rst - mean) / jnp.sqrt(var + 1e-5) * gamma + beta
    return h + rst


if __name__ == "__main__":
    key = jax.random.PRNGKey(0)
    k_h, k_a, k_ws, k_bs, k_wn, k_bn, k_g, k_be = jax.random.split(key, 8)

    N = 256        # nodes (multiple row tiles exercise the grid)
    F_in = 32      # in_feats
    F_out = 32     # out_feats (== in_feats so residual is active)

    # node features
    h = jax.random.normal(k_h, (N, F_in), dtype=jnp.float32)

    # random undirected graph as dense adjacency (no self loops)
    logits = jax.random.uniform(k_a, (N, N))
    a = (logits + logits.T > 1.0).astype(jnp.float32)
    a = a * (1.0 - jnp.eye(N, dtype=jnp.float32))

    # SAGEConv parameters (deterministic init)
    init_scale = 1.0 / jnp.sqrt(F_in)
    w_self = jax.random.uniform(k_ws, (F_in, F_out), minval=-init_scale,
                                maxval=init_scale).astype(jnp.float32)
    b_self = jax.random.uniform(k_bs, (1, F_out), minval=-init_scale,
                                maxval=init_scale).astype(jnp.float32)
    w_neigh = jax.random.uniform(k_wn, (F_in, F_out), minval=-init_scale,
                                 maxval=init_scale).astype(jnp.float32)
    b_neigh = jax.random.uniform(k_bn, (1, F_out), minval=-init_scale,
                                 maxval=init_scale).astype(jnp.float32)

    # BatchNorm1d affine params (non-trivial to actually exercise the affine)
    gamma = 1.0 + 0.1 * jax.random.uniform(k_g, (1, F_out), dtype=jnp.float32)
    beta = 0.1 * jax.random.normal(k_be, (1, F_out), dtype=jnp.float32)

    out = graphsage_layer(a, h, w_self, b_self, w_neigh, b_neigh, gamma, beta,
                          tile_rows=128)
    out = jax.block_until_ready(out)

    ref = reference(a, h, w_self, b_self, w_neigh, b_neigh, gamma, beta)
    assert out.shape == (N, F_out)
    # tolerance accommodates the approximate (EUP) reciprocal in the degree norm
    assert jnp.allclose(out, ref, atol=5e-3, rtol=5e-3), \
        float(jnp.max(jnp.abs(out - ref)))

    print("KERNEL_OK")
</pallas_src>

<mosaic_0001>
module attributes {stable_mosaic.version = 11 : i64} {
  func.func @_sage_pre_kernel(%arg0: i32, %arg1: memref<128x256xf32, #tpu.memory_space<vmem>>, %arg2: memref<128x128xf32, #tpu.memory_space<vmem>>, %arg3: memref<256x128xf32, #tpu.memory_space<vmem>>, %arg4: memref<256x128xf32, #tpu.memory_space<vmem>>, %arg5: memref<1x128xf32, #tpu.memory_space<vmem>>, %arg6: memref<128x128xf32, #tpu.memory_space<vmem>>, %arg7: memref<1x2x128xf32, #tpu.memory_space<vmem>>) attributes {dimension_semantics = [#tpu.dimension_semantics<parallel>], iteration_bounds = array<i64: 2>, scalar_prefetch = 0 : i64, scratch_operands = 0 : i64, tpu.core_type = #tpu.core_type<tc>, window_params = [{transform_indices = @transform_0, window_bounds = array<i64: 128, 256>}, {transform_indices = @transform_1, window_bounds = array<i64: 128, 128>}, {pipeline_mode = #tpu.pipeline_mode<synchronous>, transform_indices = @transform_2, window_bounds = array<i64: 256, 128>}, {pipeline_mode = #tpu.pipeline_mode<synchronous>, transform_indices = @transform_3, window_bounds = array<i64: 256, 128>}, {pipeline_mode = #tpu.pipeline_mode<synchronous>, transform_indices = @transform_4, window_bounds = array<i64: 1, 128>}, {transform_indices = @transform_5, window_bounds = array<i64: 128, 128>}, {transform_indices = @transform_6, window_bounds = array<i64: 1, 2, 128>}]} {
    %c0 = arith.constant 0 : index
    %c0_0 = arith.constant 0 : index
    %0 = vector.load %arg1[%c0, %c0_0] : memref<128x256xf32, #tpu.memory_space<vmem>>, vector<128x256xf32>
    %cst = arith.constant dense<0.000000e+00> : vector<128xf32>
    %1 = vector.multi_reduction <add>, %0, %cst [1] : vector<128x256xf32> to vector<128xf32>
    %2 = vector.shape_cast %1 : vector<128xf32> to vector<128x1xf32>
    %cst_1 = arith.constant 1.000000e+00 : f32
    %3 = vector.broadcast %cst_1 : f32 to vector<128x1xf32>
    %4 = arith.maximumf %2, %3 : vector<128x1xf32>
    %5 = tpu.reciprocal %4 {approx = true} : vector<128x1xf32> -> vector<128x1xf32>
    %c0_2 = arith.constant 0 : index
    %c0_3 = arith.constant 0 : index
    %6 = vector.load %arg3[%c0_2, %c0_3] : memref<256x128xf32, #tpu.memory_space<vmem>>, vector<256x128xf32>
    %cst_4 = arith.constant dense<0.000000e+00> : vector<128x128xf32>
    %7 = tpu.matmul %0, %6, %cst_4 {dimension_numbers = #tpu.dot_dimension_numbers<[1], [0], [0], [1], [0, 0, 1, 1], [], []>} : vector<128x256xf32>, vector<256x128xf32>, vector<128x128xf32> -> vector<128x128xf32>
    %8 = vector.broadcast %5 : vector<128x1xf32> to vector<128x128xf32>
    %9 = arith.mulf %7, %8 : vector<128x128xf32>
    %c0_5 = arith.constant 0 : index
    %c0_6 = arith.constant 0 : index
    %10 = vector.load %arg2[%c0_5, %c0_6] : memref<128x128xf32, #tpu.memory_space<vmem>>, vector<128x128xf32>
    %11 = tpu.concatenate %10, %9 in 1 : vector<128x128xf32>, vector<128x128xf32> -> vector<128x256xf32>
    %c0_7 = arith.constant 0 : index
    %c0_8 = arith.constant 0 : index
    %12 = vector.load %arg4[%c0_7, %c0_8] : memref<256x128xf32, #tpu.memory_space<vmem>>, vector<256x128xf32>
    %cst_9 = arith.constant dense<0.000000e+00> : vector<128x128xf32>
    %13 = tpu.matmul %11, %12, %cst_9 {dimension_numbers = #tpu.dot_dimension_numbers<[1], [0], [0], [1], [0, 0, 1, 1], [], []>} : vector<128x256xf32>, vector<256x128xf32>, vector<128x128xf32> -> vector<128x128xf32>
    %c0_10 = arith.constant 0 : index
    %c0_11 = arith.constant 0 : index
    %14 = vector.load %arg5[%c0_10, %c0_11] : memref<1x128xf32, #tpu.memory_space<vmem>>, vector<1x128xf32>
    %15 = vector.broadcast %14 : vector<1x128xf32> to vector<128x128xf32>
    %16 = arith.addf %13, %15 : vector<128x128xf32>
    %cst_12 = arith.constant 0.000000e+00 : f32
    %17 = vector.broadcast %cst_12 : f32 to vector<128x128xf32>
    %18 = arith.cmpf ogt, %16, %17 : vector<128x128xf32>
    %cst_13 = arith.constant 0.00999999977 : f32
    %19 = vector.broadcast %cst_13 : f32 to vector<128x128xf32>
    %20 = arith.mulf %19, %16 : vector<128x128xf32>
    %21 = arith.select %18, %16, %20 : vector<128x128xi1>, vector<128x128xf32>
    %c0_14 = arith.constant 0 : index
    %c0_15 = arith.constant 0 : index
    %22 = vector.load %arg6[%c0_14, %c0_15] : memref<128x128xf32, #tpu.memory_space<vmem>>, vector<128x128xf32>
    tpu.vector_store %arg6[%c0_14, %c0_15], %21 {strides = array<i32>} : memref<128x128xf32, #tpu.memory_space<vmem>>, vector<128x128xf32>,
    %cst_16 = arith.constant dense<0.000000e+00> : vector<128xf32>
    %23 = vector.multi_reduction <add>, %21, %cst_16 [0] : vector<128x128xf32> to vector<128xf32>
    %24 = vector.shape_cast %23 : vector<128xf32> to vector<1x128xf32>
    %25 = arith.mulf %21, %21 : vector<128x128xf32>
    %cst_17 = arith.constant dense<0.000000e+00> : vector<128xf32>
    %26 = vector.multi_reduction <add>, %25, %cst_17 [0] : vector<128x128xf32> to vector<128xf32>
    %27 = vector.shape_cast %26 : vector<128xf32> to vector<1x128xf32>
    %28 = tpu.concatenate %24, %27 in 0 : vector<1x128xf32>, vector<1x128xf32> -> vector<2x128xf32>
    %29 = vector.shape_cast %28 : vector<2x128xf32> to vector<1x2x128xf32>
    %c0_18 = arith.constant 0 : index
    %c0_19 = arith.constant 0 : index
    %c0_20 = arith.constant 0 : index
    %30 = vector.load %arg7[%c0_18, %c0_19, %c0_20] : memref<1x2x128xf32, #tpu.memory_space<vmem>>, vector<1x2x128xf32>
    tpu.vector_store %arg7[%c0_18, %c0_19, %c0_20], %29 {strides = array<i32>} : memref<1x2x128xf32, #tpu.memory_space<vmem>>, vector<1x2x128xf32>,
    return
  }
  func.func @transform_0(%arg0: i32) -> (i32, i32) {
    %c0_i32 = arith.constant 0 : i32
    %c0_i32_0 = arith.constant 0 : i32
    return %arg0, %c0_i32 : i32, i32
  }
  func.func @transform_1(%arg0: i32) -> (i32, i32) {
    %c0_i32 = arith.constant 0 : i32
    %c0_i32_0 = arith.constant 0 : i32
    return %arg0, %c0_i32 : i32, i32
  }
  func.func @transform_2(%arg0: i32) -> (i32, i32) {
    %c0_i32 = arith.constant 0 : i32
    %c0_i32_0 = arith.constant 0 : i32
    %c0_i32_1 = arith.constant 0 : i32
    return %c0_i32, %c0_i32_0 : i32, i32
  }
  func.func @transform_3(%arg0: i32) -> (i32, i32) {
    %c0_i32 = arith.constant 0 : i32
    %c0_i32_0 = arith.constant 0 : i32
    %c0_i32_1 = arith.constant 0 : i32
    return %c0_i32, %c0_i32_0 : i32, i32
  }
  func.func @transform_4(%arg0: i32) -> (i32, i32) {
    %c0_i32 = arith.constant 0 : i32
    %c0_i32_0 = arith.constant 0 : i32
    %c0_i32_1 = arith.constant 0 : i32
    return %c0_i32, %c0_i32_0 : i32, i32
  }
  func.func @transform_5(%arg0: i32) -> (i32, i32) {
    %c0_i32 = arith.constant 0 : i32
    %c0_i32_0 = arith.constant 0 : i32
    return %arg0, %c0_i32 : i32, i32
  }
  func.func @transform_6(%arg0: i32) -> (i32, i32, i32) {
    %c0_i32 = arith.constant 0 : i32
    %c0_i32_0 = arith.constant 0 : i32
    %c0_i32_1 = arith.constant 0 : i32
    return %arg0, %c0_i32, %c0_i32_0 : i32, i32, i32
  }
}

</mosaic_0001>

<bundles_post_ra>
// kernel: tpu_custom_call.1
= control target key start
LH: loop header
LB: loop body
LE: loop exit
PB: predicated region body
PF: predicated region fallthrough
CT: control target
= control target key end

     0   :  { %s2224_s0 = inlined_call_operand.hbm [shape: f32[256,256], index: 0, kind: input, shape index: {}]   ;;  %s2225_s1 = inlined_call_operand.hbm [shape: f32[256,128], index: 1, kind: input, shape index: {}]   ;;  %s2226_s2 = inlined_call_operand.hbm [shape: f32[256,128], index: 2, kind: input, shape index: {}]   ;;  %s2227_s3 = inlined_call_operand.hbm [shape: f32[256,128], index: 3, kind: input, shape index: {}]   ;;  %s2228_s4 = inlined_call_operand.vmem [shape: f32[1,128], index: 4, kind: input, shape index: {}]   ;;  %s2229_s5 = inlined_call_operand.hbm [shape: f32[256,128], index: 5, kind: output, shape index: {0}]   ;;  %s2230_s6 = inlined_call_operand.hbm [shape: f32[2,2,128], index: 6, kind: output, shape index: {1}]  }
   0x1   :  { %2236 = sst [smem:[#allocation20_spill]] %s2224_s0 }
   0x2   :  { %2237 = sst [smem:[#allocation21_spill]] %s2226_s2 }
   0x3   :  { %2238 = sst [smem:[#allocation22_spill]] %s2227_s3 }
   0x4   :  { %12 = vsyncpa [#allocation3], 0 }
   0x5   :  { %14 = vsyncpa [#allocation3 + $0x1], 0 }
   0x6   :  { %15 = vsyncpa [#allocation6], 0 }
   0x7   :  { %17 = vsyncpa [#allocation6 + $0x1], 0 }
   0x8   :  { %18 = vsyncpa [#allocation9], 0 }
   0x9   :  { %19 = vsyncpa [#allocation4], 0 }
   0xa   :  { %21 = vsyncpa [#allocation4 + $0x1], 0 }
   0xb   :  { %22 = vsyncpa [#allocation12], 0 }
   0xc   :  { %24 = vsyncpa [#allocation12 + $0x1], 0  ;;  %s1732_s21 = smov 0   ;;  %s1734_s22 = smov 0  }
   0xd   :  { %s1736_s23 = smov 0   ;;  %s1738_s24 = smov 0  }
   0xe LB: > { %s1753_s25 = sadd.s32 4294967295, %s1683_s24   ;;  %s1163_s26 = sadd.s32 4294967294, %s1683_s24   ;;  %s1683_s24 = sphi %s1738_s24, %s2264_s24   ;;  %s1679_s23 = sphi %s1736_s23, %s2263_s23   ;;  %s1675_s22 = sphi %s1734_s22, %s2262_s22   ;;  %s1671_s21 = sphi %s1732_s21, %s2261_s21  }
   0xf   : > { %p50_p0 = scmp.ne.s32.totalorder %s1675_s22, %s1671_s21  ;;  %p2233_p1 = scmp.eq.s32.totalorder %s1753_s25, 0 }
  0x10   : > { %p163_p2 = scmp.eq.s32.totalorder %s1753_s25, 1  ;;  %p169_p3 = scmp.eq.s32.totalorder %s1163_s26, 1 }
  0x11   : > { %p1762_p4 = por %p2233_p1, %p50_p0  ;;  %p1164_p5 = scmp.ge.s32.totalorder %s1683_s24, 1 }
  0x12   : > { %p1767_p6 = por %p169_p3, %p50_p0  ;;  %p202_p7 = scmp.lt.s32.totalorder %s1683_s24, 3 }
  0x13   : > { %s2239_s27 = scalar_select %p1762_p4, 1, 0 }
  0x14   : > { %s2240_s28 = scalar_select %p1767_p6, 1, 0 }
  0x15   : > { %p1772_p8 = pnand %p1164_p5, %p202_p7  ;;  %s1685_s30 = smov [#allocation7]  }
  0x16   : > { %s214_s7 = sshll.u32 %s1685_s30, 4  ;;  %s1686_s9 = smov [#allocation8]   ;;  %s215_s7 = int_to_ptr.vmem [resolvable:$true] %s214_s7 }
  0x17   : > { %p1370_p9 = pneg %p1772_p8  ;;  %s227_s10 = sshll.u32 %s1686_s9, 4  ;;  %s228_s10 = int_to_ptr.vmem [resolvable:$true] %s227_s10 }
  0x18   : > { %s1480_s11 = scalar_lea.vmem %s215_s7, 4096  ;;  %p1488_p5 = scmp.lt.s32.totalorder %s215_s7, %s215_s7 }
  0x19   : > { %p1781_p11 = pnand %p1370_p9, %p2233_p1  ;;  %p1481_p13 = scmp.ne.s32.totalorder %s215_s7, %s1480_s11 }
  0x1a   : > { %p1489_p7 = scmp.lt.s32.totalorder %s1480_s11, %s1480_s11 }
  0x1b   : > { %p1471_p12 = pneg %p1781_p11 }
  0x1c   : > { %p1490_p10 = por %p1489_p7, %p1488_p5 }
  0x1d   : > { %p1483_p0 = pnand %p1481_p13, %p1471_p12 }
  0x1f   : > { %p1484_p3 = pneg %p1483_p0 }
  0x21   : > { %p1491_p9 = pnand %p1490_p10, %p1484_p3 }
  0x23   : > { %1494 = shalt.err (!%p1491_p9)
}
  0x24   : > { %s2231_s12 = smov 128   ;;  %s2232_s13 = smov 8  }
  0x25   : > { %s2243_s2 = sld [smem:[#allocation21_spill]]  ;;  %s1506_s16 = scalar_lea.vmem %s228_s10, 4096 }
  0x26   : > { %p1507_p13 = scmp.ne.s32.totalorder %s228_s10, %s1506_s16  ;;  %p1514_p10 = scmp.lt.s32.totalorder %s228_s10, %s228_s10 }
  0x27   : > { %p1515_p3 = scmp.lt.s32.totalorder %s1506_s16, %s1506_s16 }
  0x28   : > { %p1509_p0 = pnand %p1507_p13, %p1471_p12 }
  0x29   : > { %p1516_p7 = por %p1515_p3, %p1514_p10 }
  0x2a   : > { %p1510_p5 = pneg %p1509_p0 }
  0x2b   : > { %1373 = dma.hbm_to_vmem [thread:$0]  (!%p1781_p11), %s2243_s2, 4096, %s215_s7, [#allocation6], %s2231_s12, %s2231_s12, %s2232_s13  }
  0x2c   : > { %p1517_p9 = pnand %p1516_p7, %p1510_p5 }
  0x2e   : > { %1520 = shalt.err (!%p1517_p9)
}
  0x2f   : > { %s2244_s3 = sld [smem:[#allocation22_spill]]  ;;  %s1810_s19 = sadd.s32 1, %s1683_s24  }
  0x30   : > { %s37_s20 = sadd.s32 1, %s1679_s23  ;;  %s34_s26 = ssub.s32 %s1683_s24, %s1810_s19 }
  0x31   : > { %p44_p12 = scmp.ne.s32.totalorder %s1679_s23, %s1675_s22  ;;  %p35_p13 = scmp.eq.s32.totalorder %s34_s26, 0 }
  0x32   : > { %p45_p0 = scmp.eq.s32.totalorder %s1683_s24, 0  ;;  %p1393_p10 = scmp.lt.s32.totalorder %s1683_s24, 2 }
  0x33   : > { %p1820_p5 = por %p163_p2, %p44_p12  ;;  %s1829_s8 = sand.u32 1, %s1679_s23  }
  0x34   : > { %s1826_s7 = scalar_select %p35_p13, %s1679_s23, %s37_s20  }
  0x35   : > { %1376 = dma.hbm_to_vmem [thread:$0]  (!%p1781_p11), %s2244_s3, 4096, %s228_s10, [#allocation9], %s2231_s12, %s2231_s12, %s2232_s13  }
  0x36   : > { %s2245_s30 = scalar_select %p1820_p5, 1, 0 }
  0x37   : > { %2246 = sst [smem:[#allocation19_spill]] %s1826_s7  ;;  %p46_p3 = por %p45_p0, %p44_p12 }
  0x38   : > { %s1168_s9 = sshll.u32 %s1829_s8, 8  ;;  %s1191_s10 = sshll.u32 %s1683_s24, 12 }
  0x39   : > { %s2247_s0 = sld [smem:[#allocation20_spill]]  ;;  %s248_s16 = scalar_lea.vmem [#allocation2], %s1168_s9 }
  0x3a   : > { %s256_s17 = sshll.u32 %s248_s16, 4  ;;  %p1840_p2 = pnand %p1393_p10, %p46_p3  ;;  %s1838_s17 = int_to_ptr.vmem [resolvable:$true] %s256_s17 }
  0x3b   : > { %s245_s26 = scalar_lea.sflag [#allocation3], %s1829_s8 }
  0x3c   : > { %p1523_p7 = pneg %p1840_p2 }
  0x3f   : > { %s1836_s15 = scalar_lea.hbm %s2247_s0, %s1191_s10  ;;  %s1526_s11 = scalar_lea.hbm %s2247_s0, 8192 }
  0x40   : > { %s1521_s12 = scalar_lea.hbm %s1836_s15, 4096  ;;  %p1527_p13 = scmp.lt.s32.totalorder %s1836_s15, %s2247_s0 }
  0x41   : > { %p1522_p11 = scmp.ne.s32.totalorder %s1836_s15, %s1521_s12  ;;  %p1528_p0 = scmp.lt.s32.totalorder %s1526_s11, %s1521_s12 }
  0x43   : > { %p1524_p9 = pnand %p1523_p7, %p1522_p11  ;;  %p1529_p10 = por %p1528_p0, %p1527_p13 }
  0x45   : > { %p1525_p12 = pneg %p1524_p9 }
  0x47   : > { %p1530_p3 = pnand %p1529_p10, %p1525_p12 }
  0x49   : > { %1533 = shalt.err (!%p1530_p3)
}
  0x4a   : > { %s1534_s13 = scalar_lea.vmem %s1838_s17, 4096  ;;  %s1689_s9 = smov [#allocation2]  }
  0x4b   : > { %p1535_p1 = scmp.ne.s32.totalorder %s1838_s17, %s1534_s13  ;;  %s1539_s10 = sshll.u32 %s1689_s9, 4  ;;  %s1540_s10 = int_to_ptr.vmem [resolvable:$false] %s1539_s10 }
  0x4c   : > { %s1541_s20 = scalar_lea.vmem %s1540_s10, 8192  ;;  %p1542_p6 = scmp.lt.s32.totalorder %s1838_s17, %s1540_s10 }
  0x4d   : > { %p1537_p11 = pnand %p1535_p1, %p1523_p7  ;;  %p1543_p5 = scmp.lt.s32.totalorder %s1541_s20, %s1534_s13 }
  0x4f   : > { %p1538_p9 = pneg %p1537_p11  ;;  %p1544_p4 = por %p1543_p5, %p1542_p6 }
  0x51   : > { %p1545_p13 = pnand %p1544_p4, %p1538_p9 }
  0x53   : > { %1548 = shalt.err (!%p1545_p13)
}
  0x54   : > { %s1690_s12 = smov 256   ;;  %s1691_s11 = smov 16  }
  0x55   : > { %1380 = dma.hbm_to_vmem [thread:$0]  (!%p1840_p2), %s1836_s15, 4096, %s1838_s17, %s245_s26, %s1690_s12, %s1690_s12, %s1691_s11  }
  0x56   : > { %s1172_s14 = sshll.u32 %s1829_s8, 7  ;;  %s1192_s16 = sshll.u32 %s1683_s24, 11 }
  0x57   : > { %s1877_s20 = scalar_lea.hbm %s2225_s1, %s1192_s16  ;;  %s270_s10 = scalar_lea.vmem [#allocation5], %s1172_s14 }
  0x58   : > { %s277_s0 = sshll.u32 %s270_s10, 4  ;;  %s2249_s2 = sand.u32 1, %s1683_s24   ;;  %s1879_s0 = int_to_ptr.vmem [resolvable:$true] %s277_s0 }
  0x59   : > { %s267_s3 = scalar_lea.sflag [#allocation6], %s2249_s2  ;;  %s1549_s7 = scalar_lea.hbm %s1877_s20, 2048 }
  0x5a   : > { %p1550_p1 = scmp.ne.s32.totalorder %s1877_s20, %s1549_s7  ;;  %s1554_s17 = scalar_lea.hbm %s2225_s1, 4096 }
  0x5b   : > { %p1555_p5 = scmp.lt.s32.totalorder %s1877_s20, %s2225_s1  ;;  %p1556_p12 = scmp.lt.s32.totalorder %s1554_s17, %s1549_s7 }
  0x5c   : > { %p1552_p4 = pnand %p1550_p1, %p1523_p7 }
  0x5d   : > { %p1557_p0 = por %p1556_p12, %p1555_p5 }
  0x5e   : > { %p1553_p6 = pneg %p1552_p4 }
  0x60   : > { %p1558_p10 = pnand %p1557_p0, %p1553_p6 }
  0x62   : > { %1561 = shalt.err (!%p1558_p10)
}
  0x63   : > { %s1562_s2 = scalar_lea.vmem %s1879_s0, 2048  ;;  %s1692_s11 = smov [#allocation5]  }
  0x64   : > { %p1563_p3 = scmp.ne.s32.totalorder %s1879_s0, %s1562_s2  ;;  %s1567_s14 = sshll.u32 %s1692_s11, 4  ;;  %s1568_s14 = int_to_ptr.vmem [resolvable:$false] %s1567_s14 }
  0x65   : > { %s1569_s16 = scalar_lea.vmem %s1568_s14, 4096  ;;  %p1570_p13 = scmp.lt.s32.totalorder %s1879_s0, %s1568_s14 }
  0x66   : > { %p1565_p11 = pnand %p1563_p3, %p1523_p7  ;;  %p1571_p1 = scmp.lt.s32.totalorder %s1569_s16, %s1562_s2 }
  0x68   : > { %p1566_p9 = pneg %p1565_p11  ;;  %p1572_p4 = por %p1571_p1, %p1570_p13 }
  0x6a   : > { %p1573_p5 = pnand %p1572_p4, %p1566_p9 }
  0x6c   : > { %1576 = shalt.err (!%p1573_p5)
}
  0x6d   : > { %s2250_s7 = smov 8   ;;  %s2251_s9 = smov 128  }
  0x6e   : > { %1383 = dma.hbm_to_vmem [thread:$0]  (!%p1840_p2), %s1877_s20, 2048, %s1879_s0, %s267_s3, %s2251_s9, %s2251_s9, %s2250_s7  }
  0x6f   : > { %289 = sbr.rel (%p1772_p8) target bundleno = 662 (0x296), region = 40  ;;  %s1911_s13 = sand.u32 (!%p1772_p8), 1, %s1675_s22  }
  0x70   : > { %s1176_s10 = sshll.u32 (!%p1772_p8), %s1911_s13, 8  ;;  %s292_s8 = scalar_lea.sflag (!%p1772_p8), [#allocation3], %s1911_s13 }
  0x71   : > { %s1915_s15 = scalar_lea.vmem (!%p1772_p8), [#allocation2], %s1176_s10  ;;  %p2252_p7 = scmp.ne.s32.totalorder (!%p1772_p8), %s2239_s27, 0 }
  0x74   : > { %1646 = dma.done.wait (%p2252_p7), %s292_s8, 4096  }
  0x75   : > { %1648 = vsyncadd (%p2252_p7), %s292_s8, 4294963200  ;;  %s300_s0 = sand.u32 1, %s1753_s25   ;;  %s1177_s3 = sshll.u32 %s1911_s13, 7 }
  0x76   : > { %s301_s29 = scalar_lea.sflag [#allocation6], %s300_s0  ;;  %s1925_s18 = scalar_lea.vmem [#allocation5], %s1177_s3 }
  0x77   : > { %1650 = dma.done.wait (%p2252_p7), %s301_s29, 2048  }
  0x78   : > { %1652 = vsyncadd (%p2252_p7), %s301_s29, 4294965248  ;;  %p2253_p8 = scmp.eq.s32.totalorder %s1753_s25, 0 }
  0x7a   : > { %1654 = dma.done.wait (%p2253_p8), [#allocation6], 4096   ;;  %p2254_p2 = pmov %p2253_p8 }
  0x7c   : > { %1656 = vsyncadd (%p2254_p2), [#allocation6], 4294963200  ;;  %p2255_p6 = pmov %p2254_p2 }
  0x7d   : > { %p2256_p12 = pmov %p2254_p2 }
  0x7e   : > { %1658 = dma.done.wait (%p2255_p6), [#allocation9], 4096  }
  0x7f   : > { %1660 = vsyncadd (%p2256_p12), [#allocation9], 4294963200  ;;  %v497_v0 = vld [vmem:[#allocation7 + $0xf8] sm:$0xff]  ;;  %v496_v2 = vld [vmem:[#allocation7 + $0xf0] sm:$0xff]  ;;  %s2114_s17 = scalar_lea.vmem [#allocation10], %s1177_s3  ;;  %s1193_s26 = sshll.u32 %s1753_s25, 11 }
  0x80   : > { %v481_v1 = vld [vmem:[#allocation7 + $0x78] sm:$0xff]  ;;  %1194 = vmatprep.subr.mxu0 %v497_v0  ;;  %v480_v3 = vld [vmem:[#allocation7 + $0x70] sm:$0xff]  ;;  %v495_v4 = vld [vmem:[#allocation7 + $0xe8] sm:$0xff]  ;;  %s1003_s12 = sshll.u32 %s2114_s17, 4  ;;  %s2154_s14 = scalar_lea.hbm %s2229_s5, %s1193_s26  ;;  %s2156_s12 = int_to_ptr.vmem [resolvable:$true] %s1003_s12 }
  0x81   : > { %1195 = vmatpush3.msra.mxu0 %v481_v1  ;;  %v479_v5 = vld [vmem:[#allocation7 + $0x68] sm:$0xff]  ;;  %v494_v6 = vld [vmem:[#allocation7 + $0xe0] sm:$0xff]  ;;  %v493_v8 = vld [vmem:[#allocation7 + $0xd8] sm:$0xff]  ;;  %s985_s16 = scalar_lea.sflag [#allocation4], %s1911_s13  ;;  %s1577_s7 = scalar_lea.vmem %s2156_s12, 2048 }
  0x82   : > { %1196 = vmatprep.subr.mxu0 %v496_v2  ;;  %v478_v7 = vld [vmem:[#allocation7 + $0x60] sm:$0xff]  ;;  %v477_v9 = vld [vmem:[#allocation7 + $0x58] sm:$0xff]  ;;  %v492_v10 = vld [vmem:[#allocation7 + $0xd0] sm:$0xff]  ;;  %p1578_p0 = scmp.ne.s32.totalorder %s2156_s12, %s1577_s7  ;;  %p2257_p10 = scmp.ne.s32.totalorder %s2245_s30, 0 }
  0x83   : > { %1197 = vmatpush3.msra.mxu0 %v480_v3  ;;  %v476_v11 = vld [vmem:[#allocation7 + $0x50] sm:$0xff]  ;;  %v491_v12 = vld [vmem:[#allocation7 + $0xc8] sm:$0xff]  ;;  %v1941_v15 = vld [vmem:[%s1915_s15] sm:$0xff]  ;;  %s1693_s9 = smov [#allocation10]  }
  0x84   : > { %1198 = vmatprep.subr.mxu0 %v495_v4  ;;  %v355_v13 = vld [vmem:[%s1915_s15 + $0x8] sm:$0xff]  ;;  %v490_v16 = vld [vmem:[#allocation7 + $0xc0] sm:$0xff]  ;;  %v1951_v21 = vld [vmem:[%s1915_s15 + $0x18] sm:$0xff]  ;;  %p1579_p3 = pnand %p1578_p0, %p2257_p10  ;;  %s1581_s10 = sshll.u32 %s1693_s9, 4  ;;  %s1582_s10 = int_to_ptr.vmem [resolvable:$false] %s1581_s10 }
  0x85   : > { %1199 = vmatpush3.msra.mxu0 %v479_v5  ;;  %v475_v14 = vld [vmem:[#allocation7 + $0x48] sm:$0xff]  ;;  %562 = vmatprep.mubr.f32.mxu0 %v355_v13  ;;  %v1947_v18 = vld [vmem:[%s1915_s15 + $0x20] sm:$0xff]  ;;  %v386_v19 = vadd.f32 %v355_v13, %v1941_v15  ;;  %v1954_v22 = vld [vmem:[%s1915_s15 + $0x10] sm:$0xff]  ;;  %s1583_s8 = scalar_lea.vmem %s1582_s10, 4096  ;;  %p1584_p9 = scmp.lt.s32.totalorder %s2156_s12, %s1582_s10 }
  0x86   : > { %1200 = vmatprep.subr.mxu0 %v494_v6  ;;  %v1944_v17 = vld [vmem:[%s1915_s15 + $0x28] sm:$0xff]  ;;  %v474_v20 = vld [vmem:[#allocation7 + $0x40] sm:$0xff]  ;;  %v489_v24 = vld [vmem:[#allocation7 + $0xb8] sm:$0xff]  ;;  %v389_v27 = vadd.f32 %v1951_v21, %v1954_v22  ;;  %p1580_p11 = pneg %p1579_p3  ;;  %p1585_p13 = scmp.lt.s32.totalorder %s1583_s8, %s1577_s7 }
  0x87   : > { %1201 = vmatpush3.msra.mxu0 %v478_v7  ;;  %v392_v23 = vadd.f32 %v1944_v17, %v1947_v18  ;;  %v1959_v25 = vld [vmem:[%s1915_s15 + $0x38] sm:$0xff]  ;;  %v1962_v26 = vld [vmem:[%s1915_s15 + $0x30] sm:$0xff]  ;;  %387 = vadd.xlane.f32.xlu0 %v386_v19  ;;  %v1969_v32 = vld [vmem:[%s1915_s15 + $0x48] sm:$0xff] }
  0x88   : > { %1202 = vmatprep.subr.mxu0 %v493_v8  ;;  %v473_v28 = vld [vmem:[#allocation7 + $0x38] sm:$0xff]  ;;  %v395_v29 = vadd.f32 %v1959_v25, %v1962_v26  ;;  %v488_v30 = vld [vmem:[#allocation7 + $0xb0] sm:$0xff]  ;;  %v1972_v33 = vld [vmem:[%s1915_s15 + $0x40] sm:$0xff]  ;;  %p1586_p1 = por %p1585_p13, %p1584_p9 }
  0x89   : > { %1203 = vmatpush3.msra.mxu0 %v477_v9  ;;  %393 = vadd.xlane.f32.xlu1 %v392_v23  ;;  %v472_v31 = vld [vmem:[#allocation7 + $0x30] sm:$0xff]  ;;  %v487_v34 = vld [vmem:[#allocation7 + $0xa8] sm:$0xff]  ;;  %v1975_v35 = vld [vmem:[%s1915_s15 + $0x58] sm:$0xff]  ;;  %v398_v37 = vadd.f32 %v1969_v32, %v1972_v33 }
  0x8a   : > { %1204 = vmatprep.subr.mxu0 %v492_v10  ;;  %v1978_v36 = vld [vmem:[%s1915_s15 + $0x50] sm:$0xff]  ;;  %v471_v38 = vld [vmem:[#allocation7 + $0x28] sm:$0xff]  ;;  %v486_v40 = vld [vmem:[#allocation7 + $0xa0] sm:$0xff]  ;;  %p1587_p4 = pnand %p1586_p1, %p1580_p11 }
  0x8b   : > { %1205 = vmatpush3.msra.mxu0 %v476_v11  ;;  %390 = vadd.xlane.f32.xlu0 %v389_v27  ;;  %v401_v39 = vadd.f32 %v1975_v35, %v1978_v36  ;;  %v470_v41 = vld [vmem:[#allocation7 + $0x20] sm:$0xff]  ;;  %v485_v42 = vld [vmem:[#allocation7 + $0x98] sm:$0xff]  ;;  %v1985_v43 = vld [vmem:[%s1915_s15 + $0x68] sm:$0xff] }
  0x8c   : > { %1206 = vmatprep.subr.mxu0 %v491_v12  ;;  %v1988_v44 = vld [vmem:[%s1915_s15 + $0x60] sm:$0xff]  ;;  %v706_v45 = vld [vmem:[#allocation8 + $0xf8] sm:$0xff]  ;;  %v1994_v47 = vld [vmem:[%s1915_s15 + $0x70] sm:$0xff] }
  0x8d   : > { %1207 = vmatpush3.msra.mxu0 %v475_v14  ;;  %396 = vadd.xlane.f32.xlu1 %v395_v29  ;;  %v1991_v46 = vld [vmem:[%s1915_s15 + $0x78] sm:$0xff]  ;;  %v404_v48 = vadd.f32 %v1985_v43, %v1988_v44  ;;  %v484_v52 = vld [vmem:[#allocation7 + $0x90] sm:$0xff]  ;;  %v483_v54 = vld [vmem:[#allocation7 + $0x88] sm:$0xff] }
  0x8e   : > { %1208 = vmatprep.subr.mxu0 %v490_v16  ;;  %v690_v49 = vld [vmem:[#allocation8 + $0x78] sm:$0xff]  ;;  %v407_v51 = vadd.f32 %v1991_v46, %v1994_v47  ;;  %v468_v53 = vld [vmem:[#allocation7 + $0x10] sm:$0xff]  ;;  %1274 = vmatprep.subr.mxu1 %v706_v45  ;;  %v2001_v55 = vld [vmem:[%s1915_s15 + $0x88] sm:$0xff] }
  0x8f   : > { %1209 = vmatpush3.msra.mxu0 %v474_v20  ;;  %399 = vadd.xlane.f32.xlu0 %v398_v37  ;;  %v469_v50 = vld [vmem:[#allocation7 + $0x18] sm:$0xff]  ;;  %v2004_v56 = vld [vmem:[%s1915_s15 + $0x80] sm:$0xff]  ;;  %v705_v57 = vld [vmem:[#allocation8 + $0xf0] sm:$0xff] }
  0x90   : > { %1210 = vmatprep.subr.mxu0 %v489_v24  ;;  %1275 = vmatpush3.msra.mxu1 %v690_v49  ;;  %v2007_v58 = vld [vmem:[%s1915_s15 + $0x98] sm:$0xff]  ;;  %v2010_v59 = vld [vmem:[%s1915_s15 + $0x90] sm:$0xff]  ;;  %v410_v60 = vadd.f32 %v2001_v55, %v2004_v56  ;;  %v467_v62 = vld [vmem:[#allocation7 + $0x8] sm:$0xff] }
  0x91   : > { %1211 = vmatpush3.msra.mxu0 %v473_v28  ;;  %402 = vadd.xlane.f32.xlu1 %v401_v39  ;;  %v689_v61 = vld [vmem:[#allocation8 + $0x70] sm:$0xff]  ;;  %v413_v63 = vadd.f32 %v2007_v58, %v2010_v59  ;;  %v482_v0 = vld [vmem:[#allocation7 + $0x80] sm:$0xff]  ;;  %v2017_v2 = vld [vmem:[%s1915_s15 + $0xa8] sm:$0xff] }
  0x92   : > { %1212 = vmatprep.subr.mxu0 %v488_v30  ;;  %v466_v1 = vld [vmem:[#allocation7] sm:$0xff]  ;;  %1276 = vmatprep.subr.mxu1 %v705_v57  ;;  %v704_v4 = vld [vmem:[#allocation8 + $0xe8] sm:$0xff]  ;;  %v2023_v5 = vld [vmem:[%s1915_s15 + $0xb8] sm:$0xff] }
  0x93   : > { %1213 = vmatpush3.msra.mxu0 %v472_v31  ;;  %405 = vadd.xlane.f32.xlu0 %v404_v48  ;;  %v2020_v3 = vld [vmem:[%s1915_s15 + $0xa0] sm:$0xff]  ;;  %v2026_v6 = vld [vmem:[%s1915_s15 + $0xb0] sm:$0xff]  ;;  %v688_v8 = vld [vmem:[#allocation8 + $0x68] sm:$0xff] }
  0x94   : > { %1214 = vmatprep.subr.mxu0 %v487_v34  ;;  %1277 = vmatpush3.msra.mxu1 %v689_v61  ;;  %v416_v7 = vadd.f32 %v2017_v2, %v2020_v3  ;;  %v419_v9 = vadd.f32 %v2023_v5, %v2026_v6  ;;  %v703_v10 = vld [vmem:[#allocation8 + $0xe0] sm:$0xff]  ;;  %v2034_v11 = vld [vmem:[%s1915_s15 + $0xc8] sm:$0xff]  ;;  %v2041_v14 = vld [vmem:[%s1915_s15 + $0xd8] sm:$0xff] }
  0x95   : > { %1215 = vmatpush3.msra.mxu0 %v471_v38  ;;  %408 = vadd.xlane.f32.xlu1 %v407_v51  ;;  %v2037_v12 = vld [vmem:[%s1915_s15 + $0xc0] sm:$0xff]  ;;  %v2044_v16 = vld [vmem:[%s1915_s15 + $0xd0] sm:$0xff]  ;;  %v702_v19 = vld [vmem:[#allocation8 + $0xd8] sm:$0xff] }
  0x96   : > { %1216 = vmatprep.subr.mxu0 %v486_v40  ;;  %1278 = vmatprep.subr.mxu1 %v704_v4  ;;  %v687_v13 = vld [vmem:[#allocation8 + $0x60] sm:$0xff]  ;;  %v425_v20 = vadd.f32 %v2041_v14, %v2044_v16  ;;  %v686_v23 = vld [vmem:[#allocation8 + $0x58] sm:$0xff]  ;;  %v701_v27 = vld [vmem:[#allocation8 + $0xd0] sm:$0xff] }
  0x97   : > { %1217 = vmatpush3.msra.mxu0 %v470_v41  ;;  %411 = vadd.xlane.f32.xlu0 %v410_v60  ;;  %v2055_v24 = vld [vmem:[%s1915_s15 + $0xe0] sm:$0xff]  ;;  %v385_v28 = vld [vmem:[%s1915_s15 + $0xf8] sm:$0xff]  ;;  %v384_v29 = vld [vmem:[%s1915_s15 + $0xf0] sm:$0xff] }
  0x98   : > { %1218 = vmatprep.subr.mxu0 %v485_v42  ;;  %1279 = vmatpush3.msra.mxu1 %v688_v8  ;;  %v685_v31 = vld [vmem:[#allocation8 + $0x50] sm:$0xff]  ;;  %v431_v34 = vadd.f32 %v385_v28, %v384_v29  ;;  %v684_v37 = vld [vmem:[#allocation8 + $0x48] sm:$0xff]  ;;  %v683_v38 = vld [vmem:[#allocation8 + $0x40] sm:$0xff] }
  0x99   : > { %1219 = vmatpush3.msra.mxu0 %v469_v50  ;;  %414 = vadd.xlane.f32.xlu1 %v413_v63  ;;  %v698_v39 = vld [vmem:[#allocation8 + $0xb8] sm:$0xff]  ;;  %v697_v41 = vld [vmem:[#allocation8 + $0xb0] sm:$0xff]  ;;  %v696_v42 = vld [vmem:[#allocation8 + $0xa8] sm:$0xff] }
  0x9a   : > { %1220 = vmatprep.subr.mxu0 %v484_v52  ;;  %1280 = vmatprep.subr.mxu1 %v703_v10  ;;  %v682_v40 = vld [vmem:[#allocation8 + $0x38] sm:$0xff]  ;;  %v695_v45 = vld [vmem:[#allocation8 + $0xa0] sm:$0xff] }
  0x9b   : > { %1221 = vmatpush3.msra.mxu0 %v468_v53  ;;  %417 = vadd.xlane.f32.xlu0 %v416_v7  ;;  %v694_v48 = vld [vmem:[#allocation8 + $0x98] sm:$0xff] }
  0x9c   : > { %1222 = vmatprep.subr.mxu0 %v483_v54  ;;  %1281 = vmatpush3.msra.mxu1 %v687_v13 }
  0x9d   : > { %1223 = vmatpush3.msra.mxu0 %v467_v62  ;;  %420 = vadd.xlane.f32.xlu1 %v419_v9  ;;  %v660_v9 = vld [vmem:[%s1925_s18 + $0x8] sm:$0xff] }
  0x9e   : > { %1224 = vmatprep.subr.mxu0 %v482_v0  ;;  %1282 = vmatprep.subr.mxu1 %v702_v19 }
  0x9f   : > { %1225 = vmatpush3.msra.mxu0 %v466_v1  ;;  %1283 = vmatpush3.msra.mxu1 %v686_v23 }
  0xa0   : > { %563 = vmatmul.mubr.f32.vlgmr.msra.gmra.mxu0 %v1941_v15  ;;  %v422_v15 = vadd.f32 %v2034_v11, %v2037_v12  ;;  %1284 = vmatprep.subr.mxu1 %v701_v27 }
  0xa1   : > { %567 = vmatprep.mubr.f32.mxu0 %v1951_v21  ;;  %v2052_v21 = vld [vmem:[%s1915_s15 + $0xe8] sm:$0xff]  ;;  %426 = vadd.xlane.f32.xlu1 %v425_v20  ;;  %v661_v20 = vld [vmem:[%s1925_s18 + $0x10] sm:$0xff] }
  0xa2   : > { %423 = vadd.xlane.f32.xlu0 %v422_v15  ;;  %v428_v30 = vadd.f32 %v2052_v21, %v2055_v24  ;;  %1285 = vmatpush3.msra.mxu1 %v685_v31 }
  0xa4   : > { %568 = vmatmul.mubr.f32.gmra.mxu0 %v1954_v22  ;;  %v700_v22 = vld [vmem:[#allocation8 + $0xc8] sm:$0xff] }
  0xa5   : > { %572 = vmatprep.mubr.f32.mxu0 %v1944_v17  ;;  %v699_v17 = vld [vmem:[#allocation8 + $0xc0] sm:$0xff]  ;;  %432 = vadd.xlane.f32.xlu1 %v431_v34 }
  0xa6   : > { %429 = vadd.xlane.f32.xlu0 %v428_v30  ;;  %1286 = vmatprep.subr.mxu1 %v700_v22  ;;  %v662_v30 = vld [vmem:[%s1925_s18 + $0x18] sm:$0xff] }
  0xa7   : > { %1287 = vmatpush3.msra.mxu1 %v684_v37 }
  0xa8   : > { %573 = vmatmul.mubr.f32.gmra.mxu0 %v1947_v18  ;;  %1288 = vmatprep.subr.mxu1 %v699_v17  ;;  %v681_v18 = vld [vmem:[#allocation8 + $0x30] sm:$0xff] }
  0xa9   : > { %577 = vmatprep.mubr.f32.mxu0 %v1959_v25  ;;  %1289 = vmatpush3.msra.mxu1 %v683_v38  ;;  %v680_v25 = vld [vmem:[#allocation8 + $0x28] sm:$0xff] }
  0xaa   : > { %1290 = vmatprep.subr.mxu1 %v698_v39 }
  0xab   : > { %1291 = vmatpush3.msra.mxu1 %v682_v40 }
  0xac   : > { %578 = vmatmul.mubr.f32.gmra.mxu0 %v1962_v26  ;;  %1292 = vmatprep.subr.mxu1 %v697_v41  ;;  %v679_v26 = vld [vmem:[#allocation8 + $0x20] sm:$0xff] }
  0xad   : > { %582 = vmatprep.mubr.f32.mxu0 %v1969_v32  ;;  %1293 = vmatpush3.msra.mxu1 %v681_v18  ;;  %v678_v32 = vld [vmem:[#allocation8 + $0x18] sm:$0xff]  ;;  %v663_v41 = vld [vmem:[%s1925_s18 + $0x20] sm:$0xff] }
  0xae   : > { %1294 = vmatprep.subr.mxu1 %v696_v42 }
  0xaf   : > { %1295 = vmatpush3.msra.mxu1 %v680_v25 }
  0xb0   : > { %583 = vmatmul.mubr.f32.gmra.mxu0 %v1972_v33  ;;  %1296 = vmatprep.subr.mxu1 %v695_v45  ;;  %v693_v33 = vld [vmem:[#allocation8 + $0x90] sm:$0xff] }
  0xb1   : > { %587 = vmatprep.mubr.f32.mxu0 %v1975_v35  ;;  %1297 = vmatpush3.msra.mxu1 %v679_v26  ;;  %v677_v35 = vld [vmem:[#allocation8 + $0x10] sm:$0xff] }
  0xb2   : > { %1298 = vmatprep.subr.mxu1 %v694_v48 }
  0xb3   : > { %1299 = vmatpush3.msra.mxu1 %v678_v32  ;;  %v664_v32 = vld [vmem:[%s1925_s18 + $0x28] sm:$0xff] }
  0xb4   : > { %588 = vmatmul.mubr.f32.gmra.mxu0 %v1978_v36  ;;  %1300 = vmatprep.subr.mxu1 %v693_v33  ;;  %v692_v36 = vld [vmem:[#allocation8 + $0x88] sm:$0xff] }
  0xb5   : > { %592 = vmatprep.mubr.f32.mxu0 %v1985_v43  ;;  %1301 = vmatpush3.msra.mxu1 %v677_v35  ;;  %v676_v43 = vld [vmem:[#allocation8 + $0x8] sm:$0xff] }
  0xb6   : > { %1302 = vmatprep.subr.mxu1 %v692_v36 }
  0xb7   : > { %1303 = vmatpush3.msra.mxu1 %v676_v43 }
  0xb8   : > { %593 = vmatmul.mubr.f32.gmra.mxu0 %v1988_v44  ;;  %v691_v44 = vld [vmem:[#allocation8 + $0x80] sm:$0xff] }
  0xb9   : > { %597 = vmatprep.mubr.f32.mxu0 %v1991_v46  ;;  %1304 = vmatprep.subr.mxu1 %v691_v44  ;;  %v675_v46 = vld [vmem:[#allocation8] sm:$0xff] }
  0xba   : > { %1305 = vmatpush3.msra.mxu1 %v675_v46 }
  0xbc   : > { %598 = vmatmul.mubr.f32.gmra.mxu0 %v1994_v47 }
  0xbd   : > { %602 = vmatprep.mubr.f32.mxu0 %v2001_v55 }
  0xc0   : > { %603 = vmatmul.mubr.f32.gmra.mxu0 %v2004_v56 }
  0xc1   : > { %607 = vmatprep.mubr.f32.mxu0 %v2007_v58 }
  0xc4   : > { %608 = vmatmul.mubr.f32.gmra.mxu0 %v2010_v59 }
  0xc5   : > { %612 = vmatprep.mubr.f32.mxu0 %v2017_v2  ;;  %v659_v2 = vld [vmem:[%s1925_s18] sm:$0xff] }
  0xc8   : > { %613 = vmatmul.mubr.f32.gmra.mxu0 %v2020_v3 }
  0xc9   : > { %617 = vmatprep.mubr.f32.mxu0 %v2023_v5 }
  0xcc   : > { %618 = vmatmul.mubr.f32.gmra.mxu0 %v2026_v6 }
  0xcd   : > { %622 = vmatprep.mubr.f32.mxu0 %v2034_v11 }
  0xd0   : > { %623 = vmatmul.mubr.f32.gmra.mxu0 %v2037_v12 }
  0xd1   : > { %627 = vmatprep.mubr.f32.mxu0 %v2041_v14 }
  0xd4   : > { %628 = vmatmul.mubr.f32.gmra.mxu0 %v2044_v16 }
  0xd5   : > { %632 = vmatprep.mubr.f32.mxu0 %v2052_v21 }
  0xd8   : > { %633 = vmatmul.mubr.f32.gmra.mxu0 %v2055_v24 }
  0xd9   : > { %637 = vmatprep.mubr.f32.mxu0 %v385_v28 }
  0xdc   : > { %638 = vmatmul.mubr.f32.gmra.mxu0 %v384_v29 }
 0x110   : > { %v388_v47 = vpop.xlane.xlu0 %387 }
 0x111   : > { %v434_v49 = vmax.f32 %v388_v47, 1.0 }
 0x112   : > { %v394_v51 = vpop.xlane.xlu1 %393 }
 0x113   : > { %1437 = vrcp.f32 %v434_v49  ;;  %v436_v53 = vmax.f32 %v394_v51, 1.0 }
 0x114   : > { %v391_v50 = vpop.xlane.xlu0 %390 }
 0x115   : > { %v435_v52 = vmax.f32 %v391_v50, 1.0  ;;  %v665_v50 = vld [vmem:[%s1925_s18 + $0x30] sm:$0xff] }
 0x116   : > { %v397_v54 = vpop.xlane.xlu1 %396 }
 0x117   : > { %1439 = vrcp.f32 %v435_v52  ;;  %v437_v55 = vmax.f32 %v397_v54, 1.0 }
 0x118   : > { %1441 = vrcp.f32 %v436_v53  ;;  %v400_v56 = vpop.xlane.xlu0 %399 }
 0x119   : > { %1443 = vrcp.f32 %v437_v55  ;;  %v438_v58 = vmax.f32 %v400_v56, 1.0 }
 0x11a   : > { %v403_v61 = vpop.xlane.xlu1 %402 }
 0x11b   : > { %1445 = vrcp.f32 %v438_v58  ;;  %v439_v1 = vmax.f32 %v403_v61, 1.0 }
 0x11c   : > { %v406_v5 = vpop.xlane.xlu0 %405 }
 0x11d   : > { %1447 = vrcp.f32 %v439_v1  ;;  %v440_v10 = vmax.f32 %v406_v5, 1.0 }
 0x11e   : > { %v409_v13 = vpop.xlane.xlu1 %408 }
 0x11f   : > { %1449 = vrcp.f32 %v440_v10  ;;  %v441_v19 = vmax.f32 %v409_v13, 1.0 }
 0x120   : > { %v1438_v59 = vpop.eup %1437  ;;  %v412_v24 = vpop.xlane.xlu0 %411 }
 0x121   : > { %1451 = vrcp.f32 %v441_v19  ;;  %v442_v31 = vmax.f32 %v412_v24, 1.0 }
 0x122   : > { %v415_v37 = vpop.xlane.xlu1 %414 }
 0x123   : > { %1453 = vrcp.f32 %v442_v31  ;;  %v443_v40 = vmax.f32 %v415_v37, 1.0 }
 0x124   : > { %v1440_v3 = vpop.eup %1439  ;;  %v418_v25 = vpop.xlane.xlu0 %417 }
 0x125   : > { %v1442_v11 = vpop.eup %1441  ;;  %1455 = vrcp.f32 %v443_v40  ;;  %v444_v33 = vmax.f32 %v418_v25, 1.0 }
 0x126   : > { %v1444_v23 = vpop.eup %1443  ;;  %v421_v43 = vpop.xlane.xlu1 %420 }
 0x127   : > { %1457 = vrcp.f32 %v444_v33  ;;  %v445_v49 = vmax.f32 %v421_v43, 1.0  ;;  %v673_v33 = vld [vmem:[%s1925_s18 + $0x70] sm:$0xff] }
 0x128   : > { %v1446_v34 = vpop.eup %1445 }
 0x129   : > { %1459 = vrcp.f32 %v445_v49  ;;  %v2106_v49 = vld [vmem:[%s2228_s4] ss:$0 sm:$0xff] }
 0x12a   : > { %v1448_v18 = vpop.eup %1447  ;;  %v427_v61 = vpop.xlane.xlu1 %426 }
 0x12b   : > { %v424_v53 = vpop.xlane.xlu0 %423  ;;  %v447_v1 = vmax.f32 %v427_v61, 1.0 }
 0x12c   : > { %v1450_v35 = vpop.eup %1449  ;;  %v446_v58 = vmax.f32 %v424_v53, 1.0 }
 0x12e   : > { %v1452_v51 = vpop.eup %1451  ;;  %1461 = vrcp.f32 %v446_v58  ;;  %v433_v13 = vpop.xlane.xlu1 %432 }
 0x12f   : > { %v430_v5 = vpop.xlane.xlu0 %429  ;;  %1463 = vrcp.f32 %v447_v1  ;;  %v449_v19 = vmax.f32 %v433_v13, 1.0 }
 0x130   : > { %v448_v10 = vmax.f32 %v430_v5, 1.0 }
 0x132   : > { %1465 = vrcp.f32 %v448_v10 }
 0x133   : > { %1467 = vrcp.f32 %v449_v19 }
 0x160   : > { %v1226_v57 = vpop.f32.mrf.mxu0 }
 0x162   : > { %v1227_v60 = vpop.f32.mrf.mxu0 }
 0x163   : > { %v1228_v62 = vadd.f32 %v1227_v60, %v1226_v57  ;;  %v666_v57 = vld [vmem:[%s1925_s18 + $0x38] sm:$0xff] }
 0x164   : > { %v1229_v63 = vpop.f32.mrf.mxu0 }
 0x165   : > { %v643_v0 = vmul.f32 %v1438_v59, %v1228_v62  ;;  %v1454_v59 = vpop.eup %1453 }
 0x166   : > { %v1230_v4 = vpop.f32.mrf.mxu0 }
 0x167   : > { %v1231_v6 = vadd.f32 %v1230_v4, %v1229_v63  ;;  %778 = vmatprep.mubr.f32.mxu1 %v643_v0 }
 0x168   : > { %v1232_v7 = vpop.f32.mrf.mxu0  ;;  %779 = vmatmul.mubr.f32.vlgmr.msra.gmra.mxu1 %v659_v2  ;;  %v667_v2 = vld [vmem:[%s1925_s18 + $0x40] sm:$0xff] }
 0x169   : > { %v644_v8 = vmul.f32 %v1440_v3, %v1231_v6  ;;  %v1456_v3 = vpop.eup %1455 }
 0x16a   : > { %v1233_v12 = vpop.f32.mrf.mxu0 }
 0x16b   : > { %v1234_v14 = vadd.f32 %v1233_v12, %v1232_v7  ;;  %783 = vmatprep.mubr.f32.mxu1 %v644_v8 }
 0x16c   : > { %v1235_v16 = vpop.f32.mrf.mxu0  ;;  %784 = vmatmul.mubr.f32.gmra.mxu1 %v660_v9  ;;  %v668_v9 = vld [vmem:[%s1925_s18 + $0x48] sm:$0xff] }
 0x16d   : > { %v645_v15 = vmul.f32 %v1442_v11, %v1234_v14  ;;  %v1458_v11 = vpop.eup %1457 }
 0x16e   : > { %v1236_v21 = vpop.f32.mrf.mxu0 }
 0x16f   : > { %v1237_v27 = vadd.f32 %v1236_v21, %v1235_v16  ;;  %788 = vmatprep.mubr.f32.mxu1 %v645_v15 }
 0x170   : > { %v1238_v28 = vpop.f32.mrf.mxu0  ;;  %789 = vmatmul.mubr.f32.gmra.mxu1 %v661_v20  ;;  %v669_v20 = vld [vmem:[%s1925_s18 + $0x50] sm:$0xff] }
 0x171   : > { %v646_v29 = vmul.f32 %v1444_v23, %v1237_v27  ;;  %v1460_v23 = vpop.eup %1459 }
 0x172   : > { %v1239_v22 = vpop.f32.mrf.mxu0 }
 0x173   : > { %v1240_v17 = vadd.f32 %v1239_v22, %v1238_v28  ;;  %793 = vmatprep.mubr.f32.mxu1 %v646_v29  ;;  %v670_v29 = vld [vmem:[%s1925_s18 + $0x58] sm:$0xff] }
 0x174   : > { %v1241_v38 = vpop.f32.mrf.mxu0  ;;  %794 = vmatmul.mubr.f32.gmra.mxu1 %v662_v30  ;;  %v1462_v30 = vpop.eup %1461 }
 0x175   : > { %v647_v39 = vmul.f32 %v1446_v34, %v1240_v17  ;;  %v671_v17 = vld [vmem:[%s1925_s18 + $0x60] sm:$0xff] }
 0x176   : > { %v1242_v42 = vpop.f32.mrf.mxu0 }
 0x177   : > { %v1243_v45 = vadd.f32 %v1242_v42, %v1241_v38  ;;  %798 = vmatprep.mubr.f32.mxu1 %v647_v39  ;;  %v1464_v38 = vpop.eup %1463  ;;  %v672_v42 = vld [vmem:[%s1925_s18 + $0x68] sm:$0xff] }
 0x178   : > { %v1244_v26 = vpop.f32.mrf.mxu0  ;;  %799 = vmatmul.mubr.f32.gmra.mxu1 %v663_v41  ;;  %v1466_v25 = vpop.eup %1465 }
 0x179   : > { %v648_v48 = vmul.f32 %v1448_v18, %v1243_v45 }
 0x17a   : > { %v1245_v36 = vpop.f32.mrf.mxu0 }
 0x17b   : > { %v1246_v44 = vadd.f32 %v1245_v36, %v1244_v26  ;;  %803 = vmatprep.mubr.f32.mxu1 %v648_v48 }
 0x17c   : > { %v1247_v46 = vpop.f32.mrf.mxu0  ;;  %804 = vmatmul.mubr.f32.gmra.mxu1 %v664_v32 }
 0x17d   : > { %v649_v47 = vmul.f32 %v1450_v35, %v1246_v44  ;;  %v1468_v35 = vpop.eup %1467 }
 0x17e   : > { %v1248_v52 = vpop.f32.mrf.mxu0 }
 0x17f   : > { %v1249_v54 = vadd.f32 %v1248_v52, %v1247_v46  ;;  %808 = vmatprep.mubr.f32.mxu1 %v649_v47  ;;  %v674_v46 = vld [vmem:[%s1925_s18 + $0x78] sm:$0xff] }
 0x180   : > { %v1250_v55 = vpop.f32.mrf.mxu0  ;;  %809 = vmatmul.mubr.f32.gmra.mxu1 %v665_v50 }
 0x181   : > { %v650_v56 = vmul.f32 %v1452_v51, %v1249_v54 }
 0x182   : > { %v1251_v60 = vpop.f32.mrf.mxu0 }
 0x183   : > { %v1252_v62 = vadd.f32 %v1251_v60, %v1250_v55  ;;  %813 = vmatprep.mubr.f32.mxu1 %v650_v56 }
 0x184   : > { %v1253_v63 = vpop.f32.mrf.mxu0  ;;  %814 = vmatmul.mubr.f32.gmra.mxu1 %v666_v57 }
 0x185   : > { %v651_v0 = vmul.f32 %v1454_v59, %v1252_v62 }
 0x186   : > { %v1254_v4 = vpop.f32.mrf.mxu0 }
 0x187   : > { %v1255_v6 = vadd.f32 %v1254_v4, %v1253_v63  ;;  %818 = vmatprep.mubr.f32.mxu1 %v651_v0 }
 0x188   : > { %v1256_v7 = vpop.f32.mrf.mxu0  ;;  %819 = vmatmul.mubr.f32.gmra.mxu1 %v667_v2 }
 0x189   : > { %v652_v8 = vmul.f32 %v1456_v3, %v1255_v6 }
 0x18a   : > { %v1257_v12 = vpop.f32.mrf.mxu0 }
 0x18b   : > { %v1258_v14 = vadd.f32 %v1257_v12, %v1256_v7  ;;  %823 = vmatprep.mubr.f32.mxu1 %v652_v8 }
 0x18c   : > { %v1259_v16 = vpop.f32.mrf.mxu0  ;;  %824 = vmatmul.mubr.f32.gmra.mxu1 %v668_v9 }
 0x18d   : > { %v653_v15 = vmul.f32 %v1458_v11, %v1258_v14 }
 0x18e   : > { %v1260_v21 = vpop.f32.mrf.mxu0 }
 0x18f   : > { %v1261_v24 = vadd.f32 %v1260_v21, %v1259_v16  ;;  %828 = vmatprep.mubr.f32.mxu1 %v653_v15 }
 0x190   : > { %v1262_v27 = vpop.f32.mrf.mxu0  ;;  %829 = vmatmul.mubr.f32.gmra.mxu1 %v669_v20 }
 0x191   : > { %v654_v28 = vmul.f32 %v1460_v23, %v1261_v24 }
 0x192   : > { %v1263_v31 = vpop.f32.mrf.mxu0 }
 0x193   : > { %v1264_v34 = vadd.f32 %v1263_v31, %v1262_v27  ;;  %833 = vmatprep.mubr.f32.mxu1 %v654_v28 }
 0x194   : > { %v1265_v22 = vpop.f32.mrf.mxu0  ;;  %834 = vmatmul.mubr.f32.gmra.mxu1 %v670_v29 }
 0x195   : > { %v655_v37 = vmul.f32 %v1462_v30, %v1264_v34 }
 0x196   : > { %v1266_v39 = vpop.f32.mrf.mxu0 }
 0x197   : > { %v1267_v40 = vadd.f32 %v1266_v39, %v1265_v22  ;;  %838 = vmatprep.mubr.f32.mxu1 %v655_v37 }
 0x198   : > { %v1268_v41 = vpop.f32.mrf.mxu0  ;;  %839 = vmatmul.mubr.f32.gmra.mxu1 %v671_v17 }
 0x199   : > { %v656_v18 = vmul.f32 %v1464_v38, %v1267_v40 }
 0x19a   : > { %v1269_v45 = vpop.f32.mrf.mxu0 }
 0x19b   : > { %v1270_v26 = vadd.f32 %v1269_v45, %v1268_v41  ;;  %843 = vmatprep.mubr.f32.mxu1 %v656_v18 }
 0x19c   : > { %v1271_v48 = vpop.f32.mrf.mxu0  ;;  %844 = vmatmul.mubr.f32.gmra.mxu1 %v672_v42 }
 0x19d   : > { %v657_v32 = vmul.f32 %v1466_v25, %v1270_v26 }
 0x19e   : > { %v1272_v36 = vpop.f32.mrf.mxu0 }
 0x19f   : > { %v1273_v43 = vadd.f32 %v1272_v36, %v1271_v48  ;;  %848 = vmatprep.mubr.f32.mxu1 %v657_v32 }
 0x1a0   : > { %849 = vmatmul.mubr.f32.gmra.mxu1 %v673_v33 }
 0x1a1   : > { %v658_v44 = vmul.f32 %v1468_v35, %v1273_v43 }
 0x1a3   : > { %853 = vmatprep.mubr.f32.mxu1 %v658_v44 }
 0x1a4   : > { %854 = vmatmul.mubr.f32.gmra.mxu1 %v674_v46 }
 0x228   : > { %v1306_v47 = vpop.f32.mrf.mxu1 }
 0x22a   : > { %v1307_v50 = vpop.f32.mrf.mxu1 }
 0x22b   : > { %v1308_v51 = vadd.f32 %v1307_v50, %v1306_v47 }
 0x22c   : > { %v1309_v52 = vpop.f32.mrf.mxu1 }
 0x22d   : > { %v781_v53 = vadd.f32 %v1308_v51, %v2106_v49 }
 0x22e   : > { %v1310_v54 = vpop.f32.mrf.mxu1 }
 0x22f   : > { %vm859_vm0 = vcmp.gt.f32.partialorder %v781_v53, 0.0  ;;  %v875_v55 = vmul.f32 0.01, %v781_v53  ;;  %v1311_v56 = vadd.f32 %v1310_v54, %v1309_v52 }
 0x230   : > { %v1312_v57 = vpop.f32.mrf.mxu1 }
 0x231   : > { %v2109_v58 = vsel %vm859_vm0, %v781_v53, %v875_v55  ;;  %v786_v59 = vadd.f32 %v1311_v56, %v2106_v49 }
 0x232   : > { %907 = vst [vmem:[%s2114_s17] sm:$0xff] %v2109_v58  ;;  %v1313_v60 = vpop.f32.mrf.mxu1  ;;  %v944_v43 = vmul.f32 %v2109_v58, %v2109_v58 }
 0x233   : > { %vm860_vm1 = vcmp.gt.f32.partialorder %v786_v59, 0.0  ;;  %v876_v61 = vmul.f32 0.01, %v786_v59  ;;  %v1314_v62 = vadd.f32 %v1313_v60, %v1312_v57 }
 0x234   : > { %v1315_v63 = vpop.f32.mrf.mxu1 }
 0x235   : > { %v892_v0 = vsel %vm860_vm1, %v786_v59, %v876_v61  ;;  %v791_v1 = vadd.f32 %v1314_v62, %v2106_v49 }
 0x236   : > { %908 = vst [vmem:[%s2114_s17 + $0x8] sm:$0xff] %v892_v0  ;;  %v1316_v2 = vpop.f32.mrf.mxu1  ;;  %v945_v32 = vmul.f32 %v892_v0, %v892_v0  ;;  %v923_v44 = vadd.f32 %v892_v0, %v2109_v58 }
 0x237   : > { %vm861_vm2 = vcmp.gt.f32.partialorder %v791_v1, 0.0  ;;  %v877_v3 = vmul.f32 0.01, %v791_v1  ;;  %v1317_v4 = vadd.f32 %v1316_v2, %v1315_v63 }
 0x238   : > { %v1318_v5 = vpop.f32.mrf.mxu1  ;;  %v960_v52 = vadd.f32 %v945_v32, %v944_v43 }
 0x239   : > { %v893_v6 = vsel %vm861_vm2, %v791_v1, %v877_v3  ;;  %v796_v7 = vadd.f32 %v1317_v4, %v2106_v49 }
 0x23a   : > { %909 = vst [vmem:[%s2114_s17 + $0x10] sm:$0xff] %v893_v6  ;;  %v1319_v8 = vpop.f32.mrf.mxu1  ;;  %v946_v46 = vmul.f32 %v893_v6, %v893_v6  ;;  %v924_v53 = vadd.f32 %v923_v44, %v893_v6 }
 0x23b   : > { %vm862_vm3 = vcmp.gt.f32.partialorder %v796_v7, 0.0  ;;  %v878_v9 = vmul.f32 0.01, %v796_v7  ;;  %v1320_v10 = vadd.f32 %v1319_v8, %v1318_v5 }
 0x23c   : > { %v1321_v11 = vpop.f32.mrf.mxu1  ;;  %v961_v59 = vadd.f32 %v960_v52, %v946_v46 }
 0x23d   : > { %v894_v12 = vsel %vm862_vm3, %v796_v7, %v878_v9  ;;  %v801_v13 = vadd.f32 %v1320_v10, %v2106_v49 }
 0x23e   : > { %910 = vst [vmem:[%s2114_s17 + $0x18] sm:$0xff] %v894_v12  ;;  %v1322_v14 = vpop.f32.mrf.mxu1  ;;  %v947_v54 = vmul.f32 %v894_v12, %v894_v12  ;;  %v925_v60 = vadd.f32 %v924_v53, %v894_v12 }
 0x23f   : > { %vm863_vm4 = vcmp.gt.f32.partialorder %v801_v13, 0.0  ;;  %v879_v16 = vmul.f32 0.01, %v801_v13  ;;  %v1323_v15 = vadd.f32 %v1322_v14, %v1321_v11 }
 0x240   : > { %v1324_v19 = vpop.f32.mrf.mxu1  ;;  %v962_v0 = vadd.f32 %v961_v59, %v947_v54 }
 0x241   : > { %v895_v20 = vsel %vm863_vm4, %v801_v13, %v879_v16  ;;  %v806_v23 = vadd.f32 %v1323_v15, %v2106_v49 }
 0x242   : > { %911 = vst [vmem:[%s2114_s17 + $0x20] sm:$0xff] %v895_v20  ;;  %v1325_v21 = vpop.f32.mrf.mxu1  ;;  %v948_v61 = vmul.f32 %v895_v20, %v895_v20  ;;  %v926_v1 = vadd.f32 %v925_v60, %v895_v20 }
 0x243   : > { %vm864_vm5 = vcmp.gt.f32.partialorder %v806_v23, 0.0  ;;  %v880_v24 = vmul.f32 0.01, %v806_v23  ;;  %v1326_v27 = vadd.f32 %v1325_v21, %v1324_v19 }
 0x244   : > { %v1327_v28 = vpop.f32.mrf.mxu1  ;;  %v963_v6 = vadd.f32 %v962_v0, %v948_v61 }
 0x245   : > { %v896_v29 = vsel %vm864_vm5, %v806_v23, %v880_v24  ;;  %v811_v30 = vadd.f32 %v1326_v27, %v2106_v49 }
 0x246   : > { %912 = vst [vmem:[%s2114_s17 + $0x28] sm:$0xff] %v896_v29  ;;  %v1328_v31 = vpop.f32.mrf.mxu1  ;;  %v949_v2 = vmul.f32 %v896_v29, %v896_v29  ;;  %v927_v7 = vadd.f32 %v926_v1, %v896_v29 }
 0x247   : > { %vm865_vm6 = vcmp.gt.f32.partialorder %v811_v30, 0.0  ;;  %v881_v34 = vmul.f32 0.01, %v811_v30  ;;  %v1329_v22 = vadd.f32 %v1328_v31, %v1327_v28 }
 0x248   : > { %v1330_v37 = vpop.f32.mrf.mxu1  ;;  %v964_v12 = vadd.f32 %v963_v6, %v949_v2 }
 0x249   : > { %v897_v17 = vsel %vm865_vm6, %v811_v30, %v881_v34  ;;  %v816_v38 = vadd.f32 %v1329_v22, %v2106_v49 }
 0x24a   : > { %913 = vst [vmem:[%s2114_s17 + $0x30] sm:$0xff] %v897_v17  ;;  %v1331_v39 = vpop.f32.mrf.mxu1  ;;  %v950_v8 = vmul.f32 %v897_v17, %v897_v17  ;;  %v928_v13 = vadd.f32 %v927_v7, %v897_v17 }
 0x24b   : > { %vm866_vm7 = vcmp.gt.f32.partialorder %v816_v38, 0.0  ;;  %v882_v40 = vmul.f32 0.01, %v816_v38  ;;  %v1332_v41 = vadd.f32 %v1331_v39, %v1330_v37 }
 0x24c   : > { %v1333_v18 = vpop.f32.mrf.mxu1  ;;  %v965_v20 = vadd.f32 %v964_v12, %v950_v8 }
 0x24d   : > { %v898_v42 = vsel %vm866_vm7, %v816_v38, %v882_v40  ;;  %v821_v25 = vadd.f32 %v1332_v41, %v2106_v49 }
 0x24e   : > { %914 = vst [vmem:[%s2114_s17 + $0x38] sm:$0xff] %v898_v42  ;;  %v1334_v45 = vpop.f32.mrf.mxu1  ;;  %v951_v14 = vmul.f32 %v898_v42, %v898_v42  ;;  %v929_v23 = vadd.f32 %v928_v13, %v898_v42 }
 0x24f   : > { %vm867_vm8 = vcmp.gt.f32.partialorder %v821_v25, 0.0  ;;  %v883_v26 = vmul.f32 0.01, %v821_v25  ;;  %v1335_v48 = vadd.f32 %v1334_v45, %v1333_v18 }
 0x250   : > { %v1336_v33 = vpop.f32.mrf.mxu1  ;;  %v966_v29 = vadd.f32 %v965_v20, %v951_v14 }
 0x251   : > { %v899_v35 = vsel %vm867_vm8, %v821_v25, %v883_v26  ;;  %v826_v36 = vadd.f32 %v1335_v48, %v2106_v49 }
 0x252   : > { %915 = vst [vmem:[%s2114_s17 + $0x40] sm:$0xff] %v899_v35  ;;  %v1337_v47 = vpop.f32.mrf.mxu1  ;;  %v952_v21 = vmul.f32 %v899_v35, %v899_v35  ;;  %v930_v30 = vadd.f32 %v929_v23, %v899_v35 }
 0x253   : > { %vm868_vm9 = vcmp.gt.f32.partialorder %v826_v36, 0.0  ;;  %v884_v50 = vmul.f32 0.01, %v826_v36  ;;  %v1338_v51 = vadd.f32 %v1337_v47, %v1336_v33 }
 0x254   : > { %v1339_v55 = vpop.f32.mrf.mxu1  ;;  %v967_v17 = vadd.f32 %v966_v29, %v952_v21 }
 0x255   : > { %v900_v56 = vsel %vm868_vm9, %v826_v36, %v884_v50  ;;  %v831_v57 = vadd.f32 %v1338_v51, %v2106_v49 }
 0x256   : > { %916 = vst [vmem:[%s2114_s17 + $0x48] sm:$0xff] %v900_v56  ;;  %v1340_v58 = vpop.f32.mrf.mxu1  ;;  %v953_v31 = vmul.f32 %v900_v56, %v900_v56  ;;  %v931_v38 = vadd.f32 %v930_v30, %v900_v56 }
 0x257   : > { %vm869_vm10 = vcmp.gt.f32.partialorder %v831_v57, 0.0  ;;  %v885_v62 = vmul.f32 0.01, %v831_v57  ;;  %v1341_v63 = vadd.f32 %v1340_v58, %v1339_v55 }
 0x258   : > { %v1342_v3 = vpop.f32.mrf.mxu1  ;;  %v968_v42 = vadd.f32 %v967_v17, %v953_v31 }
 0x259   : > { %v901_v4 = vsel %vm869_vm10, %v831_v57, %v885_v62  ;;  %v836_v5 = vadd.f32 %v1341_v63, %v2106_v49 }
 0x25a   : > { %917 = vst [vmem:[%s2114_s17 + $0x50] sm:$0xff] %v901_v4  ;;  %v1343_v9 = vpop.f32.mrf.mxu1  ;;  %v954_v39 = vmul.f32 %v901_v4, %v901_v4  ;;  %v932_v25 = vadd.f32 %v931_v38, %v901_v4 }
 0x25b   : > { %vm870_vm11 = vcmp.gt.f32.partialorder %v836_v5, 0.0  ;;  %v886_v10 = vmul.f32 0.01, %v836_v5  ;;  %v1344_v11 = vadd.f32 %v1343_v9, %v1342_v3 }
 0x25c   : > { %v1345_v16 = vpop.f32.mrf.mxu1  ;;  %v969_v33 = vadd.f32 %v968_v42, %v954_v39 }
 0x25d   : > { %v902_v15 = vsel %vm870_vm11, %v836_v5, %v886_v10  ;;  %v841_v19 = vadd.f32 %v1344_v11, %v2106_v49 }
 0x25e   : > { %918 = vst [vmem:[%s2114_s17 + $0x58] sm:$0xff] %v902_v15  ;;  %v1346_v24 = vpop.f32.mrf.mxu1  ;;  %v955_v45 = vmul.f32 %v902_v15, %v902_v15  ;;  %v933_v35 = vadd.f32 %v932_v25, %v902_v15 }
 0x25f   : > { %vm871_vm12 = vcmp.gt.f32.partialorder %v841_v19, 0.0  ;;  %v887_v27 = vmul.f32 0.01, %v841_v19  ;;  %v1347_v28 = vadd.f32 %v1346_v24, %v1345_v16 }
 0x260   : > { %v1348_v34 = vpop.f32.mrf.mxu1  ;;  %v970_v47 = vadd.f32 %v969_v33, %v955_v45 }
 0x261   : > { %v903_v22 = vsel %vm871_vm12, %v841_v19, %v887_v27  ;;  %v846_v37 = vadd.f32 %v1347_v28, %v2106_v49 }
 0x262   : > { %919 = vst [vmem:[%s2114_s17 + $0x60] sm:$0xff] %v903_v22  ;;  %v1349_v40 = vpop.f32.mrf.mxu1  ;;  %v956_v36 = vmul.f32 %v903_v22, %v903_v22  ;;  %v934_v50 = vadd.f32 %v933_v35, %v903_v22 }
 0x263   : > { %vm872_vm13 = vcmp.gt.f32.partialorder %v846_v37, 0.0  ;;  %v888_v41 = vmul.f32 0.01, %v846_v37  ;;  %v1350_v18 = vadd.f32 %v1349_v40, %v1348_v34 }
 0x264   : > { %v1351_v26 = vpop.f32.mrf.mxu1  ;;  %v971_v54 = vadd.f32 %v970_v47, %v956_v36 }
 0x265   : > { %v904_v48 = vsel %vm872_vm13, %v846_v37, %v888_v41  ;;  %v851_v32 = vadd.f32 %v1350_v18, %v2106_v49 }
 0x266   : > { %920 = vst [vmem:[%s2114_s17 + $0x68] sm:$0xff] %v904_v48  ;;  %v1352_v43 = vpop.f32.mrf.mxu1  ;;  %v957_v51 = vmul.f32 %v904_v48, %v904_v48  ;;  %v935_v55 = vadd.f32 %v934_v50, %v904_v48 }
 0x267   : > { %vm873_vm14 = vcmp.gt.f32.partialorder %v851_v32, 0.0  ;;  %v889_v44 = vmul.f32 0.01, %v851_v32  ;;  %v1353_v46 = vadd.f32 %v1352_v43, %v1351_v26 }
 0x268   : > { %v972_v59 = vadd.f32 %v971_v54, %v957_v51 }
 0x269   : > { %v905_v52 = vsel %vm873_vm14, %v851_v32, %v889_v44  ;;  %v856_v53 = vadd.f32 %v1353_v46, %v2106_v49 }
 0x26a   : > { %921 = vst [vmem:[%s2114_s17 + $0x70] sm:$0xff] %v905_v52  ;;  %v958_v56 = vmul.f32 %v905_v52, %v905_v52  ;;  %v936_v49 = vadd.f32 %v935_v55, %v905_v52 }
 0x26b   : > { %vm874_vm15 = vcmp.gt.f32.partialorder %v856_v53, 0.0  ;;  %v890_v57 = vmul.f32 0.01, %v856_v53 }
 0x26c   : > { %v973_v61 = vadd.f32 %v972_v59, %v958_v56 }
 0x26d   : > { %v906_v60 = vsel %vm874_vm15, %v856_v53, %v890_v57 }
 0x26e   : > { %922 = vst [vmem:[%s2114_s17 + $0x78] sm:$0xff] %v906_v60  ;;  %v937_v58 = vadd.f32 %v936_v49, %v906_v60  ;;  %v959_v62 = vmul.f32 %v906_v60, %v906_v60 }
 0x26f   : > { %1590 = shalt.err (!%p1587_p4)
}
 0x270   : > { %s1591_s15 = scalar_lea.hbm %s2154_s14, 2048  ;;  %s1595_s29 = scalar_lea.hbm %s2229_s5, 4096 }
 0x271   : > { %p1592_p5 = scmp.ne.s32.totalorder %s2154_s14, %s1591_s15  ;;  %p1596_p2 = scmp.lt.s32.totalorder %s2154_s14, %s2229_s5 }
 0x272   : > { %p1597_p6 = scmp.lt.s32.totalorder %s1595_s29, %s1591_s15 }
 0x273   : > { %p1593_p7 = pnand %p1592_p5, %p2257_p10 }
 0x274   : > { %p1598_p12 = por %p1597_p6, %p1596_p2 }
 0x275   : > { %p1594_p8 = pneg %p1593_p7 }
 0x277   : > { %p1599_p0 = pnand %p1598_p12, %p1594_p8 }
 0x279   : > { %1602 = shalt.err (!%p1599_p0)
}
 0x27a   : > { %s1694_s20 = smov 128   ;;  %s1695_s17 = smov 8   ;;  %v938_v63 = vrot.slane %v937_v58, 4  ;;  %v974_v0 = vadd.f32 %v973_v61, %v959_v62  ;;  %vm981_vm0 = vcmask 1040384  }
 0x27b   : > { %1366 = dma.vmem_to_hbm [thread:$0]  (%p2257_p10), %s2156_s12, 2048, %s2154_s14, %s985_s16, %s1694_s20, %s1694_s20, %s1695_s17  }
 0x27c   : > { %v939_v1 = vadd.f32 %v938_v63, %v937_v58  ;;  %v975_v2 = vrot.slane %v974_v0, 4  ;;  %s1181_s26 = sshll.u32 %s1911_s13, 1  ;;  %s1187_s2 = sshll.u32 %s1753_s25, 5 }
 0x27d   : > { %s350_s11 = scalar_lea.vmem [#allocation11], %s1181_s26  ;;  %s2187_s16 = scalar_lea.hbm %s2230_s6, %s1187_s2 }
 0x27e   : > { %v940_v3 = vrot.slane %v939_v1, 2  ;;  %v976_v4 = vadd.f32 %v975_v2, %v974_v0  ;;  %s1019_s7 = sshll.u32 %s350_s11, 4  ;;  %s990_s9 = scalar_lea.sflag [#allocation12], %s1911_s13  ;;  %s1020_s7 = int_to_ptr.vmem [resolvable:$true] %s1019_s7 }
 0x27f   : > { %s1603_s10 = scalar_lea.vmem %s1020_s7, 32  ;;  %s1696_s25 = smov [#allocation11]  }
 0x280   : > { %v941_v5 = vadd.f32 %v940_v3, %v939_v1  ;;  %v977_v6 = vrot.slane %v976_v4, 2  ;;  %p1604_p3 = scmp.ne.s32.totalorder %s1020_s7, %s1603_s10  ;;  %s1607_s8 = sshll.u32 %s1696_s25, 4  ;;  %s1608_s8 = int_to_ptr.vmem [resolvable:$false] %s1607_s8 }
 0x281   : > { %s1609_s15 = scalar_lea.vmem %s1608_s8, 64  ;;  %p1610_p13 = scmp.lt.s32.totalorder %s1020_s7, %s1608_s8 }
 0x282   : > { %v942_v7 = vrot.slane %v941_v5, 1  ;;  %v978_v8 = vadd.f32 %v977_v6, %v976_v4  ;;  %p1605_p11 = pnand %p1604_p3, %p2257_p10  ;;  %p1611_p1 = scmp.lt.s32.totalorder %s1609_s15, %s1603_s10 }
 0x284   : > { %v979_v9 = vrot.slane %v978_v8, 1  ;;  %v943_v10 = vadd.f32 %v942_v7, %v941_v5  ;;  %p1606_p9 = pneg %p1605_p11  ;;  %p1612_p4 = por %p1611_p1, %p1610_p13 }
 0x286   : > { %v980_v11 = vadd.f32 %v979_v9, %v978_v8  ;;  %p1613_p5 = pnand %p1612_p4, %p1606_p9 }
 0x288   : > { %v982_v12 = vsel %vm981_vm0, %v943_v10, %v980_v11 }
 0x289   : > { %983 = vst [vmem:[%s350_s11] sm:$0x3] %v982_v12 }
 0x28a   : > { %1616 = shalt.err (!%p1613_p5)
}
 0x28b   : > { %s1617_s0 = scalar_lea.hbm %s2187_s16, 32  ;;  %s1621_s29 = scalar_lea.hbm %s2230_s6, 64 }
 0x28c   : > { %p1618_p7 = scmp.ne.s32.totalorder %s2187_s16, %s1617_s0  ;;  %p1622_p6 = scmp.lt.s32.totalorder %s2187_s16, %s2230_s6 }
 0x28d   : > { %p1623_p12 = scmp.lt.s32.totalorder %s1621_s29, %s1617_s0 }
 0x28e   : > { %p1619_p8 = pnand %p1618_p7, %p2257_p10 }
 0x28f   : > { %p1624_p0 = por %p1623_p12, %p1622_p6 }
 0x290   : > { %p1620_p2 = pneg %p1619_p8 }
 0x292   : > { %p1625_p3 = pnand %p1624_p0, %p1620_p2 }
 0x294   : > { %1628 = shalt.err (!%p1625_p3)
}
 0x295   : > { %1367 = dma.vmem_to_hbm [thread:$0]  (%p2257_p10), %s1020_s7, 32, %s2187_s16, %s990_s9  }
 0x296 PF: > { %s1031_s20 = sand.u32 1, %s1671_s21   ;;  %p2258_p11 = scmp.ne.s32.totalorder %s2240_s28, 0 }
 0x297   : > { %p2259_p9 = scmp.ge.s32.totalorder %s1683_s24, 2  ;;  %s1032_s17 = scalar_lea.sflag [#allocation4], %s1031_s20 }
 0x299   : > { %p1385_p13 = pnand %p2259_p9, %p2258_p11 }
 0x29b   : > { %p1386_p1 = pneg %p1385_p13 }
 0x29d   : > { %1662 = dma.done.wait (%p1386_p1), %s1032_s17, 2048  }
 0x29e   : > { %1664 = vsyncadd (%p1386_p1), %s1032_s17, 4294965248  ;;  %s1041_s26 = scalar_lea.sflag [#allocation12], %s1031_s20 }
 0x29f   : > { %1666 = dma.done.wait (%p1386_p1), %s1041_s26, 32  }
 0x2a0   : > { %1668 = vsyncadd (%p1386_p1), %s1041_s26, 4294967264  ;;  %s2260_s30 = sld [smem:[#allocation19_spill]]  ;;  %p27_p10 = scmp.ge.s32.totalorder %s1810_s19, 4  }
 0x2a1   : > { %s2261_s21 = smov %s1675_s22  ;;  %s2262_s22 = smov %s1679_s23 }
 0x2a2   : > { %s2264_s24 = smov %s1810_s19  ;;  %29 = sbr.rel (!%p27_p10) target bundleno = 14 (0xe), region = 123 }
 0x2a6   : > { %s2263_s23 = smov %s2260_s30 }
 0x2a7   :  { %1046 = vsyncpa [#allocation3], 1 }
 0x2a8   :  { %1048 = vsyncpa [#allocation3 + $0x1], 1 }
 0x2a9   :  { %1049 = vsyncpa [#allocation6], 1 }
 0x2aa   :  { %1051 = vsyncpa [#allocation6 + $0x1], 1 }
 0x2ab   :  { %1052 = vsyncpa [#allocation9], 1 }
 0x2ac   :  { %1053 = vsyncpa [#allocation4], 1 }
 0x2ad   :  { %1055 = vsyncpa [#allocation4 + $0x1], 1 }
 0x2ae   :  { %1056 = vsyncpa [#allocation12], 1 }
 0x2af   :  { %1058 = vsyncpa [#allocation12 + $0x1], 1 }

</bundles_post_ra>
